<compile_context>
chip_gen: v6e
topology: v6e:2x2x1
jax: 0.10.0
libtpu: 0.0.40
codegen_flags: <defaults>
</compile_context>

<pallas_src>
import functools

import jax
import jax.numpy as jnp
from jax import lax
from jax.experimental import pallas as pl
from jax.experimental.pallas import tpu as pltpu


def t5_self_attn_kernel(x_ref, wqkv_ref, wo_ref, o_ref, *,
                        batch, seq, n_heads, d_kv, eps):
    """Single-step fused kernel over a flattened (B*S, D) view.

    x_ref    : (B*S, D)        hidden states (residual source)
    wqkv_ref : (D, 3*inner)    fused projection weight with LN scale folded in
    wo_ref   : (inner, D)      output projection weight
    o_ref    : (B*S, D)        hidden_states + attention_output
    """
    d_model = x_ref.shape[-1]
    inner = n_heads * d_kv

    x = x_ref[...].astype(jnp.float32)                     # (B*S, D)

    # --- T5LayerNorm (RMS, no mean subtraction). The learned scale is folded into wqkv.
    var = jnp.mean(x * x, axis=-1, keepdims=True)
    normed = x * lax.rsqrt(var + eps)                      # (B*S, D)

    # --- Fused Q|K|V projection: one MXU matmul with N = 3*inner.
    qkv = jnp.dot(normed, wqkv_ref[...],
                  preferred_element_type=jnp.float32)      # (B*S, 3*inner)

    wo = wo_ref[...]                                       # (inner, D)

    # --- Per-batch, per-head attention (T5: NO 1/sqrt(d_kv) scaling).
    # batch and n_heads are tiny and static -> full Python unroll.
    for b in range(batch):
        r0 = b * seq
        attn_b = jnp.zeros((seq, d_model), jnp.float32)
        for h in range(n_heads):
            lo = h * d_kv
            qh = qkv[r0:r0 + seq, lo:lo + d_kv]                       # (S, d_kv)
            kh = qkv[r0:r0 + seq, inner + lo:inner + lo + d_kv]       # (S, d_kv)
            vh = qkv[r0:r0 + seq, 2 * inner + lo:2 * inner + lo + d_kv]

            # scores = qh @ kh^T, contracting on the last dim of both (no transpose op).
            scores = lax.dot_general(
                qh, kh, (((1,), (1,)), ((), ())),
                preferred_element_type=jnp.float32)                   # (S, S)
            scores = scores - jnp.max(scores, axis=-1, keepdims=True)
            p = jnp.exp(scores)
            p = p * pl.reciprocal(jnp.sum(p, axis=-1, keepdims=True), approx=True)

            ctx = jnp.dot(p, vh, preferred_element_type=jnp.float32)  # (S, d_kv)
            # Accumulate directly into the (S, D) output via the matching Wo row block
            # (static weight slice) -- avoids a lane-dim concatenate over heads.
            attn_b = attn_b + jnp.dot(ctx, wo[lo:lo + d_kv, :],
                                      preferred_element_type=jnp.float32)

        # Residual add (dropout is identity in eval mode); static sublane slice store.
        o_ref[r0:r0 + seq, :] = (x[r0:r0 + seq, :] + attn_b).astype(o_ref.dtype)


def t5_layer_self_attention(hidden_states, params, *, n_heads, d_kv, eps=1e-6):
    """hidden_states: (B, S, D). params: ln_w (1,D), wq/wk/wv (D,inner), wo (inner,D)."""
    B, S, D = hidden_states.shape
    inner = n_heads * d_kv

    # One-time preprocessing OUTSIDE the kernel:
    #   fuse Q|K|V and fold the T5LayerNorm scale into the projection rows.
    wqkv = jnp.concatenate([params["wq"], params["wk"], params["wv"]], axis=1)  # (D, 3*inner)
    wqkv = params["ln_w"].reshape(D, 1) * wqkv

    x2d = hidden_states.reshape(B * S, D)

    kernel = functools.partial(t5_self_attn_kernel, batch=B, seq=S,
                               n_heads=n_heads, d_kv=d_kv, eps=eps)

    out2d = pl.pallas_call(
        kernel,
        out_shape=jax.ShapeDtypeStruct((B * S, D), hidden_states.dtype),
        grid_spec=pltpu.PrefetchScalarGridSpec(
            num_scalar_prefetch=0,
            grid=(1,),                                       # single step: whole problem at once
            in_specs=[
                pl.BlockSpec((B * S, D), lambda i: (0, 0)),        # flattened hidden states
                pl.BlockSpec((D, 3 * inner), lambda i: (0, 0)),    # fused (LN-folded) QKV weight
                pl.BlockSpec((inner, D), lambda i: (0, 0)),        # Wo
            ],
            out_specs=pl.BlockSpec((B * S, D), lambda i: (0, 0)),
        ),
        compiler_params=pltpu.CompilerParams(
            dimension_semantics=("arbitrary",)),
    )(x2d, wqkv, params["wo"])

    return out2d.reshape(B, S, D)


def init_params(key, d_model, n_heads, d_kv, dtype=jnp.float32):
    inner = n_heads * d_kv
    ks = jax.random.split(key, 5)
    scale = 0.05
    return {
        # T5LayerNorm weight is initialized to ones in torch; perturb deterministically.
        "ln_w": jnp.ones((1, d_model), dtype)
                + scale * jax.random.normal(ks[0], (1, d_model), dtype),
        "wq": scale * jax.random.normal(ks[1], (d_model, inner), dtype),
        "wk": scale * jax.random.normal(ks[2], (d_model, inner), dtype),
        "wv": scale * jax.random.normal(ks[3], (d_model, inner), dtype),
        "wo": scale * jax.random.normal(ks[4], (inner, d_model), dtype),
    }


def reference_jax(hidden, params, *, n_heads, d_kv, eps=1e-6):
    """Pure-JAX reference mirroring the torch module (for sanity check)."""
    B, S, D = hidden.shape
    xf = hidden.astype(jnp.float32)
    var = jnp.mean(xf * xf, axis=-1, keepdims=True)
    normed = params["ln_w"][0] * (xf * lax.rsqrt(var + eps))
    q = normed @ params["wq"]
    k = normed @ params["wk"]
    v = normed @ params["wv"]
    qh = q.reshape(B, S, n_heads, d_kv).transpose(0, 2, 1, 3)
    kh = k.reshape(B, S, n_heads, d_kv).transpose(0, 2, 1, 3)
    vh = v.reshape(B, S, n_heads, d_kv).transpose(0, 2, 1, 3)
    scores = jnp.einsum("bhqd,bhkd->bhqk", qh, kh)          # no 1/sqrt(d) in T5
    p = jax.nn.softmax(scores, axis=-1)
    ctx = jnp.einsum("bhqk,bhkd->bhqd", p, vh)
    ctx = ctx.transpose(0, 2, 1, 3).reshape(B, S, n_heads * d_kv)
    return hidden + ctx @ params["wo"]


if __name__ == "__main__":
    B, S, d_model, n_heads, d_kv = 2, 8, 32, 4, 8

    key = jax.random.PRNGKey(0)
    k_h, k_p = jax.random.split(key)
    hidden = jax.random.normal(k_h, (B, S, d_model), jnp.float32)
    params = init_params(k_p, d_model, n_heads, d_kv)

    out = t5_layer_self_attention(hidden, params, n_heads=n_heads, d_kv=d_kv)
    out = jax.block_until_ready(out)

    ref = reference_jax(hidden, params, n_heads=n_heads, d_kv=d_kv)
    assert out.shape == (B, S, d_model)
    # Slightly looser tolerance than before: softmax denominator now uses the EUP
    # approximate reciprocal (relative error ~2^-12).
    assert jnp.allclose(out, ref, atol=2e-3, rtol=2e-3), "mismatch vs reference"

    print("KERNEL_OK")
</pallas_src>

<mosaic_0001>
module attributes {stable_mosaic.version = 11 : i64} {
  func.func @t5_self_attn_kernel(%arg0: i32, %arg1: memref<16x32xf32, #tpu.memory_space<vmem>>, %arg2: memref<32x96xf32, #tpu.memory_space<vmem>>, %arg3: memref<32x32xf32, #tpu.memory_space<vmem>>, %arg4: memref<16x32xf32, #tpu.memory_space<vmem>>) attributes {dimension_semantics = [#tpu.dimension_semantics<arbitrary>], iteration_bounds = array<i64: 1>, scalar_prefetch = 0 : i64, scratch_operands = 0 : i64, tpu.core_type = #tpu.core_type<tc>, window_params = [{pipeline_mode = #tpu.pipeline_mode<synchronous>, transform_indices = @transform_0, window_bounds = array<i64: 16, 32>}, {pipeline_mode = #tpu.pipeline_mode<synchronous>, transform_indices = @transform_1, window_bounds = array<i64: 32, 96>}, {pipeline_mode = #tpu.pipeline_mode<synchronous>, transform_indices = @transform_2, window_bounds = array<i64: 32, 32>}, {pipeline_mode = #tpu.pipeline_mode<synchronous>, transform_indices = @transform_3, window_bounds = array<i64: 16, 32>}]} {
    %c0 = arith.constant 0 : index
    %c0_0 = arith.constant 0 : index
    %0 = vector.load %arg1[%c0, %c0_0] : memref<16x32xf32, #tpu.memory_space<vmem>>, vector<16x32xf32>
    %1 = arith.mulf %0, %0 : vector<16x32xf32>
    %cst = arith.constant dense<0.000000e+00> : vector<16xf32>
    %2 = vector.multi_reduction <add>, %1, %cst [1] : vector<16x32xf32> to vector<16xf32>
    %3 = vector.shape_cast %2 : vector<16xf32> to vector<16x1xf32>
    %cst_1 = arith.constant 3.200000e+01 : f32
    %4 = vector.broadcast %cst_1 : f32 to vector<16x1xf32>
    %5 = arith.divf %3, %4 : vector<16x1xf32>
    %cst_2 = arith.constant 9.99999997E-7 : f32
    %6 = vector.broadcast %cst_2 : f32 to vector<16x1xf32>
    %7 = arith.addf %5, %6 : vector<16x1xf32>
    %8 = math.rsqrt %7 : vector<16x1xf32>
    %9 = vector.broadcast %8 : vector<16x1xf32> to vector<16x32xf32>
    %10 = arith.mulf %0, %9 : vector<16x32xf32>
    %c0_3 = arith.constant 0 : index
    %c0_4 = arith.constant 0 : index
    %11 = vector.load %arg2[%c0_3, %c0_4] : memref<32x96xf32, #tpu.memory_space<vmem>>, vector<32x96xf32>
    %cst_5 = arith.constant dense<0.000000e+00> : vector<16x96xf32>
    %12 = tpu.matmul %10, %11, %cst_5 {dimension_numbers = #tpu.dot_dimension_numbers<[1], [0], [0], [1], [0, 0, 1, 1], [], []>} : vector<16x32xf32>, vector<32x96xf32>, vector<16x96xf32> -> vector<16x96xf32>
    %c0_6 = arith.constant 0 : index
    %c0_7 = arith.constant 0 : index
    %13 = vector.load %arg3[%c0_6, %c0_7] : memref<32x32xf32, #tpu.memory_space<vmem>>, vector<32x32xf32>
    %cst_8 = arith.constant 0.000000e+00 : f32
    %14 = vector.broadcast %cst_8 : f32 to vector<8x32xf32>
    %15 = vector.extract_strided_slice %12 {offsets = [0, 0], sizes = [8, 8], strides = [1, 1]} : vector<16x96xf32> to vector<8x8xf32>
    %16 = vector.extract_strided_slice %12 {offsets = [0, 32], sizes = [8, 8], strides = [1, 1]} : vector<16x96xf32> to vector<8x8xf32>
    %17 = vector.extract_strided_slice %12 {offsets = [0, 64], sizes = [8, 8], strides = [1, 1]} : vector<16x96xf32> to vector<8x8xf32>
    %cst_9 = arith.constant dense<0.000000e+00> : vector<8x8xf32>
    %18 = tpu.matmul %15, %16, %cst_9 {dimension_numbers = #tpu.dot_dimension_numbers<[1], [1], [0], [0], [0, 0, 1, 0], [], []>} : vector<8x8xf32>, vector<8x8xf32>, vector<8x8xf32> -> vector<8x8xf32>
    %cst_10 = arith.constant dense<0xFF800000> : vector<8xf32>
    %19 = vector.multi_reduction <maximumf>, %18, %cst_10 [1] : vector<8x8xf32> to vector<8xf32>
    %20 = vector.shape_cast %19 : vector<8xf32> to vector<8x1xf32>
    %21 = vector.broadcast %20 : vector<8x1xf32> to vector<8x8xf32>
    %22 = arith.subf %18, %21 : vector<8x8xf32>
    %23 = math.exp %22 : vector<8x8xf32>
    %cst_11 = arith.constant dense<0.000000e+00> : vector<8xf32>
    %24 = vector.multi_reduction <add>, %23, %cst_11 [1] : vector<8x8xf32> to vector<8xf32>
    %25 = vector.shape_cast %24 : vector<8xf32> to vector<8x1xf32>
    %26 = tpu.reciprocal %25 {approx = true} : vector<8x1xf32> -> vector<8x1xf32>
    %27 = vector.broadcast %26 : vector<8x1xf32> to vector<8x8xf32>
    %28 = arith.mulf %23, %27 : vector<8x8xf32>
    %cst_12 = arith.constant dense<0.000000e+00> : vector<8x8xf32>
    %29 = tpu.matmul %28, %17, %cst_12 {dimension_numbers = #tpu.dot_dimension_numbers<[1], [0], [0], [1], [0, 0, 1, 1], [], []>} : vector<8x8xf32>, vector<8x8xf32>, vector<8x8xf32> -> vector<8x8xf32>
    %30 = vector.extract_strided_slice %13 {offsets = [0, 0], sizes = [8, 32], strides = [1, 1]} : vector<32x32xf32> to vector<8x32xf32>
    %cst_13 = arith.constant dense<0.000000e+00> : vector<8x32xf32>
    %31 = tpu.matmul %29, %30, %cst_13 {dimension_numbers = #tpu.dot_dimension_numbers<[1], [0], [0], [1], [0, 0, 1, 1], [], []>} : vector<8x8xf32>, vector<8x32xf32>, vector<8x32xf32> -> vector<8x32xf32>
    %32 = arith.addf %14, %31 : vector<8x32xf32>
    %33 = vector.extract_strided_slice %12 {offsets = [0, 8], sizes = [8, 8], strides = [1, 1]} : vector<16x96xf32> to vector<8x8xf32>
    %34 = vector.extract_strided_slice %12 {offsets = [0, 40], sizes = [8, 8], strides = [1, 1]} : vector<16x96xf32> to vector<8x8xf32>
    %35 = vector.extract_strided_slice %12 {offsets = [0, 72], sizes = [8, 8], strides = [1, 1]} : vector<16x96xf32> to vector<8x8xf32>
    %cst_14 = arith.constant dense<0.000000e+00> : vector<8x8xf32>
    %36 = tpu.matmul %33, %34, %cst_14 {dimension_numbers = #tpu.dot_dimension_numbers<[1], [1], [0], [0], [0, 0, 1, 0], [], []>} : vector<8x8xf32>, vector<8x8xf32>, vector<8x8xf32> -> vector<8x8xf32>
    %cst_15 = arith.constant dense<0xFF800000> : vector<8xf32>
    %37 = vector.multi_reduction <maximumf>, %36, %cst_15 [1] : vector<8x8xf32> to vector<8xf32>
    %38 = vector.shape_cast %37 : vector<8xf32> to vector<8x1xf32>
    %39 = vector.broadcast %38 : vector<8x1xf32> to vector<8x8xf32>
    %40 = arith.subf %36, %39 : vector<8x8xf32>
    %41 = math.exp %40 : vector<8x8xf32>
    %cst_16 = arith.constant dense<0.000000e+00> : vector<8xf32>
    %42 = vector.multi_reduction <add>, %41, %cst_16 [1] : vector<8x8xf32> to vector<8xf32>
    %43 = vector.shape_cast %42 : vector<8xf32> to vector<8x1xf32>
    %44 = tpu.reciprocal %43 {approx = true} : vector<8x1xf32> -> vector<8x1xf32>
    %45 = vector.broadcast %44 : vector<8x1xf32> to vector<8x8xf32>
    %46 = arith.mulf %41, %45 : vector<8x8xf32>
    %cst_17 = arith.constant dense<0.000000e+00> : vector<8x8xf32>
    %47 = tpu.matmul %46, %35, %cst_17 {dimension_numbers = #tpu.dot_dimension_numbers<[1], [0], [0], [1], [0, 0, 1, 1], [], []>} : vector<8x8xf32>, vector<8x8xf32>, vector<8x8xf32> -> vector<8x8xf32>
    %48 = vector.extract_strided_slice %13 {offsets = [8, 0], sizes = [8, 32], strides = [1, 1]} : vector<32x32xf32> to vector<8x32xf32>
    %cst_18 = arith.constant dense<0.000000e+00> : vector<8x32xf32>
    %49 = tpu.matmul %47, %48, %cst_18 {dimension_numbers = #tpu.dot_dimension_numbers<[1], [0], [0], [1], [0, 0, 1, 1], [], []>} : vector<8x8xf32>, vector<8x32xf32>, vector<8x32xf32> -> vector<8x32xf32>
    %50 = arith.addf %32, %49 : vector<8x32xf32>
    %51 = vector.extract_strided_slice %12 {offsets = [0, 16], sizes = [8, 8], strides = [1, 1]} : vector<16x96xf32> to vector<8x8xf32>
    %52 = vector.extract_strided_slice %12 {offsets = [0, 48], sizes = [8, 8], strides = [1, 1]} : vector<16x96xf32> to vector<8x8xf32>
    %53 = vector.extract_strided_slice %12 {offsets = [0, 80], sizes = [8, 8], strides = [1, 1]} : vector<16x96xf32> to vector<8x8xf32>
    %cst_19 = arith.constant dense<0.000000e+00> : vector<8x8xf32>
    %54 = tpu.matmul %51, %52, %cst_19 {dimension_numbers = #tpu.dot_dimension_numbers<[1], [1], [0], [0], [0, 0, 1, 0], [], []>} : vector<8x8xf32>, vector<8x8xf32>, vector<8x8xf32> -> vector<8x8xf32>
    %cst_20 = arith.constant dense<0xFF800000> : vector<8xf32>
    %55 = vector.multi_reduction <maximumf>, %54, %cst_20 [1] : vector<8x8xf32> to vector<8xf32>
    %56 = vector.shape_cast %55 : vector<8xf32> to vector<8x1xf32>
    %57 = vector.broadcast %56 : vector<8x1xf32> to vector<8x8xf32>
    %58 = arith.subf %54, %57 : vector<8x8xf32>
    %59 = math.exp %58 : vector<8x8xf32>
    %cst_21 = arith.constant dense<0.000000e+00> : vector<8xf32>
    %60 = vector.multi_reduction <add>, %59, %cst_21 [1] : vector<8x8xf32> to vector<8xf32>
    %61 = vector.shape_cast %60 : vector<8xf32> to vector<8x1xf32>
    %62 = tpu.reciprocal %61 {approx = true} : vector<8x1xf32> -> vector<8x1xf32>
    %63 = vector.broadcast %62 : vector<8x1xf32> to vector<8x8xf32>
    %64 = arith.mulf %59, %63 : vector<8x8xf32>
    %cst_22 = arith.constant dense<0.000000e+00> : vector<8x8xf32>
    %65 = tpu.matmul %64, %53, %cst_22 {dimension_numbers = #tpu.dot_dimension_numbers<[1], [0], [0], [1], [0, 0, 1, 1], [], []>} : vector<8x8xf32>, vector<8x8xf32>, vector<8x8xf32> -> vector<8x8xf32>
    %66 = vector.extract_strided_slice %13 {offsets = [16, 0], sizes = [8, 32], strides = [1, 1]} : vector<32x32xf32> to vector<8x32xf32>
    %cst_23 = arith.constant dense<0.000000e+00> : vector<8x32xf32>
    %67 = tpu.matmul %65, %66, %cst_23 {dimension_numbers = #tpu.dot_dimension_numbers<[1], [0], [0], [1], [0, 0, 1, 1], [], []>} : vector<8x8xf32>, vector<8x32xf32>, vector<8x32xf32> -> vector<8x32xf32>
    %68 = arith.addf %50, %67 : vector<8x32xf32>
    %69 = vector.extract_strided_slice %12 {offsets = [0, 24], sizes = [8, 8], strides = [1, 1]} : vector<16x96xf32> to vector<8x8xf32>
    %70 = vector.extract_strided_slice %12 {offsets = [0, 56], sizes = [8, 8], strides = [1, 1]} : vector<16x96xf32> to vector<8x8xf32>
    %71 = vector.extract_strided_slice %12 {offsets = [0, 88], sizes = [8, 8], strides = [1, 1]} : vector<16x96xf32> to vector<8x8xf32>
    %cst_24 = arith.constant dense<0.000000e+00> : vector<8x8xf32>
    %72 = tpu.matmul %69, %70, %cst_24 {dimension_numbers = #tpu.dot_dimension_numbers<[1], [1], [0], [0], [0, 0, 1, 0], [], []>} : vector<8x8xf32>, vector<8x8xf32>, vector<8x8xf32> -> vector<8x8xf32>
    %cst_25 = arith.constant dense<0xFF800000> : vector<8xf32>
    %73 = vector.multi_reduction <maximumf>, %72, %cst_25 [1] : vector<8x8xf32> to vector<8xf32>
    %74 = vector.shape_cast %73 : vector<8xf32> to vector<8x1xf32>
    %75 = vector.broadcast %74 : vector<8x1xf32> to vector<8x8xf32>
    %76 = arith.subf %72, %75 : vector<8x8xf32>
    %77 = math.exp %76 : vector<8x8xf32>
    %cst_26 = arith.constant dense<0.000000e+00> : vector<8xf32>
    %78 = vector.multi_reduction <add>, %77, %cst_26 [1] : vector<8x8xf32> to vector<8xf32>
    %79 = vector.shape_cast %78 : vector<8xf32> to vector<8x1xf32>
    %80 = tpu.reciprocal %79 {approx = true} : vector<8x1xf32> -> vector<8x1xf32>
    %81 = vector.broadcast %80 : vector<8x1xf32> to vector<8x8xf32>
    %82 = arith.mulf %77, %81 : vector<8x8xf32>
    %cst_27 = arith.constant dense<0.000000e+00> : vector<8x8xf32>
    %83 = tpu.matmul %82, %71, %cst_27 {dimension_numbers = #tpu.dot_dimension_numbers<[1], [0], [0], [1], [0, 0, 1, 1], [], []>} : vector<8x8xf32>, vector<8x8xf32>, vector<8x8xf32> -> vector<8x8xf32>
    %84 = vector.extract_strided_slice %13 {offsets = [24, 0], sizes = [8, 32], strides = [1, 1]} : vector<32x32xf32> to vector<8x32xf32>
    %cst_28 = arith.constant dense<0.000000e+00> : vector<8x32xf32>
    %85 = tpu.matmul %83, %84, %cst_28 {dimension_numbers = #tpu.dot_dimension_numbers<[1], [0], [0], [1], [0, 0, 1, 1], [], []>} : vector<8x8xf32>, vector<8x32xf32>, vector<8x32xf32> -> vector<8x32xf32>
    %86 = arith.addf %68, %85 : vector<8x32xf32>
    %87 = vector.extract_strided_slice %0 {offsets = [0, 0], sizes = [8, 32], strides = [1, 1]} : vector<16x32xf32> to vector<8x32xf32>
    %88 = arith.addf %87, %86 : vector<8x32xf32>
    %c0_29 = arith.constant 0 : index
    %c0_30 = arith.constant 0 : index
    %89 = vector.load %arg4[%c0_29, %c0_30] : memref<16x32xf32, #tpu.memory_space<vmem>>, vector<8x32xf32>
    tpu.vector_store %arg4[%c0_29, %c0_30], %88 {strides = array<i32>} : memref<16x32xf32, #tpu.memory_space<vmem>>, vector<8x32xf32>,
    %cst_31 = arith.constant 0.000000e+00 : f32
    %90 = vector.broadcast %cst_31 : f32 to vector<8x32xf32>
    %91 = vector.extract_strided_slice %12 {offsets = [8, 0], sizes = [8, 8], strides = [1, 1]} : vector<16x96xf32> to vector<8x8xf32>
    %92 = vector.extract_strided_slice %12 {offsets = [8, 32], sizes = [8, 8], strides = [1, 1]} : vector<16x96xf32> to vector<8x8xf32>
    %93 = vector.extract_strided_slice %12 {offsets = [8, 64], sizes = [8, 8], strides = [1, 1]} : vector<16x96xf32> to vector<8x8xf32>
    %cst_32 = arith.constant dense<0.000000e+00> : vector<8x8xf32>
    %94 = tpu.matmul %91, %92, %cst_32 {dimension_numbers = #tpu.dot_dimension_numbers<[1], [1], [0], [0], [0, 0, 1, 0], [], []>} : vector<8x8xf32>, vector<8x8xf32>, vector<8x8xf32> -> vector<8x8xf32>
    %cst_33 = arith.constant dense<0xFF800000> : vector<8xf32>
    %95 = vector.multi_reduction <maximumf>, %94, %cst_33 [1] : vector<8x8xf32> to vector<8xf32>
    %96 = vector.shape_cast %95 : vector<8xf32> to vector<8x1xf32>
    %97 = vector.broadcast %96 : vector<8x1xf32> to vector<8x8xf32>
    %98 = arith.subf %94, %97 : vector<8x8xf32>
    %99 = math.exp %98 : vector<8x8xf32>
    %cst_34 = arith.constant dense<0.000000e+00> : vector<8xf32>
    %100 = vector.multi_reduction <add>, %99, %cst_34 [1] : vector<8x8xf32> to vector<8xf32>
    %101 = vector.shape_cast %100 : vector<8xf32> to vector<8x1xf32>
    %102 = tpu.reciprocal %101 {approx = true} : vector<8x1xf32> -> vector<8x1xf32>
    %103 = vector.broadcast %102 : vector<8x1xf32> to vector<8x8xf32>
    %104 = arith.mulf %99, %103 : vector<8x8xf32>
    %cst_35 = arith.constant dense<0.000000e+00> : vector<8x8xf32>
    %105 = tpu.matmul %104, %93, %cst_35 {dimension_numbers = #tpu.dot_dimension_numbers<[1], [0], [0], [1], [0, 0, 1, 1], [], []>} : vector<8x8xf32>, vector<8x8xf32>, vector<8x8xf32> -> vector<8x8xf32>
    %106 = vector.extract_strided_slice %13 {offsets = [0, 0], sizes = [8, 32], strides = [1, 1]} : vector<32x32xf32> to vector<8x32xf32>
    %cst_36 = arith.constant dense<0.000000e+00> : vector<8x32xf32>
    %107 = tpu.matmul %105, %106, %cst_36 {dimension_numbers = #tpu.dot_dimension_numbers<[1], [0], [0], [1], [0, 0, 1, 1], [], []>} : vector<8x8xf32>, vector<8x32xf32>, vector<8x32xf32> -> vector<8x32xf32>
    %108 = arith.addf %90, %107 : vector<8x32xf32>
    %109 = vector.extract_strided_slice %12 {offsets = [8, 8], sizes = [8, 8], strides = [1, 1]} : vector<16x96xf32> to vector<8x8xf32>
    %110 = vector.extract_strided_slice %12 {offsets = [8, 40], sizes = [8, 8], strides = [1, 1]} : vector<16x96xf32> to vector<8x8xf32>
    %111 = vector.extract_strided_slice %12 {offsets = [8, 72], sizes = [8, 8], strides = [1, 1]} : vector<16x96xf32> to vector<8x8xf32>
    %cst_37 = arith.constant dense<0.000000e+00> : vector<8x8xf32>
    %112 = tpu.matmul %109, %110, %cst_37 {dimension_numbers = #tpu.dot_dimension_numbers<[1], [1], [0], [0], [0, 0, 1, 0], [], []>} : vector<8x8xf32>, vector<8x8xf32>, vector<8x8xf32> -> vector<8x8xf32>
    %cst_38 = arith.constant dense<0xFF800000> : vector<8xf32>
    %113 = vector.multi_reduction <maximumf>, %112, %cst_38 [1] : vector<8x8xf32> to vector<8xf32>
    %114 = vector.shape_cast %113 : vector<8xf32> to vector<8x1xf32>
    %115 = vector.broadcast %114 : vector<8x1xf32> to vector<8x8xf32>
    %116 = arith.subf %112, %115 : vector<8x8xf32>
    %117 = math.exp %116 : vector<8x8xf32>
    %cst_39 = arith.constant dense<0.000000e+00> : vector<8xf32>
    %118 = vector.multi_reduction <add>, %117, %cst_39 [1] : vector<8x8xf32> to vector<8xf32>
    %119 = vector.shape_cast %118 : vector<8xf32> to vector<8x1xf32>
    %120 = tpu.reciprocal %119 {approx = true} : vector<8x1xf32> -> vector<8x1xf32>
    %121 = vector.broadcast %120 : vector<8x1xf32> to vector<8x8xf32>
    %122 = arith.mulf %117, %121 : vector<8x8xf32>
    %cst_40 = arith.constant dense<0.000000e+00> : vector<8x8xf32>
    %123 = tpu.matmul %122, %111, %cst_40 {dimension_numbers = #tpu.dot_dimension_numbers<[1], [0], [0], [1], [0, 0, 1, 1], [], []>} : vector<8x8xf32>, vector<8x8xf32>, vector<8x8xf32> -> vector<8x8xf32>
    %124 = vector.extract_strided_slice %13 {offsets = [8, 0], sizes = [8, 32], strides = [1, 1]} : vector<32x32xf32> to vector<8x32xf32>
    %cst_41 = arith.constant dense<0.000000e+00> : vector<8x32xf32>
    %125 = tpu.matmul %123, %124, %cst_41 {dimension_numbers = #tpu.dot_dimension_numbers<[1], [0], [0], [1], [0, 0, 1, 1], [], []>} : vector<8x8xf32>, vector<8x32xf32>, vector<8x32xf32> -> vector<8x32xf32>
    %126 = arith.addf %108, %125 : vector<8x32xf32>
    %127 = vector.extract_strided_slice %12 {offsets = [8, 16], sizes = [8, 8], strides = [1, 1]} : vector<16x96xf32> to vector<8x8xf32>
    %128 = vector.extract_strided_slice %12 {offsets = [8, 48], sizes = [8, 8], strides = [1, 1]} : vector<16x96xf32> to vector<8x8xf32>
    %129 = vector.extract_strided_slice %12 {offsets = [8, 80], sizes = [8, 8], strides = [1, 1]} : vector<16x96xf32> to vector<8x8xf32>
    %cst_42 = arith.constant dense<0.000000e+00> : vector<8x8xf32>
    %130 = tpu.matmul %127, %128, %cst_42 {dimension_numbers = #tpu.dot_dimension_numbers<[1], [1], [0], [0], [0, 0, 1, 0], [], []>} : vector<8x8xf32>, vector<8x8xf32>, vector<8x8xf32> -> vector<8x8xf32>
    %cst_43 = arith.constant dense<0xFF800000> : vector<8xf32>
    %131 = vector.multi_reduction <maximumf>, %130, %cst_43 [1] : vector<8x8xf32> to vector<8xf32>
    %132 = vector.shape_cast %131 : vector<8xf32> to vector<8x1xf32>
    %133 = vector.broadcast %132 : vector<8x1xf32> to vector<8x8xf32>
    %134 = arith.subf %130, %133 : vector<8x8xf32>
    %135 = math.exp %134 : vector<8x8xf32>
    %cst_44 = arith.constant dense<0.000000e+00> : vector<8xf32>
    %136 = vector.multi_reduction <add>, %135, %cst_44 [1] : vector<8x8xf32> to vector<8xf32>
    %137 = vector.shape_cast %136 : vector<8xf32> to vector<8x1xf32>
    %138 = tpu.reciprocal %137 {approx = true} : vector<8x1xf32> -> vector<8x1xf32>
    %139 = vector.broadcast %138 : vector<8x1xf32> to vector<8x8xf32>
    %140 = arith.mulf %135, %139 : vector<8x8xf32>
    %cst_45 = arith.constant dense<0.000000e+00> : vector<8x8xf32>
    %141 = tpu.matmul %140, %129, %cst_45 {dimension_numbers = #tpu.dot_dimension_numbers<[1], [0], [0], [1], [0, 0, 1, 1], [], []>} : vector<8x8xf32>, vector<8x8xf32>, vector<8x8xf32> -> vector<8x8xf32>
    %142 = vector.extract_strided_slice %13 {offsets = [16, 0], sizes = [8, 32], strides = [1, 1]} : vector<32x32xf32> to vector<8x32xf32>
    %cst_46 = arith.constant dense<0.000000e+00> : vector<8x32xf32>
    %143 = tpu.matmul %141, %142, %cst_46 {dimension_numbers = #tpu.dot_dimension_numbers<[1], [0], [0], [1], [0, 0, 1, 1], [], []>} : vector<8x8xf32>, vector<8x32xf32>, vector<8x32xf32> -> vector<8x32xf32>
    %144 = arith.addf %126, %143 : vector<8x32xf32>
    %145 = vector.extract_strided_slice %12 {offsets = [8, 24], sizes = [8, 8], strides = [1, 1]} : vector<16x96xf32> to vector<8x8xf32>
    %146 = vector.extract_strided_slice %12 {offsets = [8, 56], sizes = [8, 8], strides = [1, 1]} : vector<16x96xf32> to vector<8x8xf32>
    %147 = vector.extract_strided_slice %12 {offsets = [8, 88], sizes = [8, 8], strides = [1, 1]} : vector<16x96xf32> to vector<8x8xf32>
    %cst_47 = arith.constant dense<0.000000e+00> : vector<8x8xf32>
    %148 = tpu.matmul %145, %146, %cst_47 {dimension_numbers = #tpu.dot_dimension_numbers<[1], [1], [0], [0], [0, 0, 1, 0], [], []>} : vector<8x8xf32>, vector<8x8xf32>, vector<8x8xf32> -> vector<8x8xf32>
    %cst_48 = arith.constant dense<0xFF800000> : vector<8xf32>
    %149 = vector.multi_reduction <maximumf>, %148, %cst_48 [1] : vector<8x8xf32> to vector<8xf32>
    %150 = vector.shape_cast %149 : vector<8xf32> to vector<8x1xf32>
    %151 = vector.broadcast %150 : vector<8x1xf32> to vector<8x8xf32>
    %152 = arith.subf %148, %151 : vector<8x8xf32>
    %153 = math.exp %152 : vector<8x8xf32>
    %cst_49 = arith.constant dense<0.000000e+00> : vector<8xf32>
    %154 = vector.multi_reduction <add>, %153, %cst_49 [1] : vector<8x8xf32> to vector<8xf32>
    %155 = vector.shape_cast %154 : vector<8xf32> to vector<8x1xf32>
    %156 = tpu.reciprocal %155 {approx = true} : vector<8x1xf32> -> vector<8x1xf32>
    %157 = vector.broadcast %156 : vector<8x1xf32> to vector<8x8xf32>
    %158 = arith.mulf %153, %157 : vector<8x8xf32>
    %cst_50 = arith.constant dense<0.000000e+00> : vector<8x8xf32>
    %159 = tpu.matmul %158, %147, %cst_50 {dimension_numbers = #tpu.dot_dimension_numbers<[1], [0], [0], [1], [0, 0, 1, 1], [], []>} : vector<8x8xf32>, vector<8x8xf32>, vector<8x8xf32> -> vector<8x8xf32>
    %160 = vector.extract_strided_slice %13 {offsets = [24, 0], sizes = [8, 32], strides = [1, 1]} : vector<32x32xf32> to vector<8x32xf32>
    %cst_51 = arith.constant dense<0.000000e+00> : vector<8x32xf32>
    %161 = tpu.matmul %159, %160, %cst_51 {dimension_numbers = #tpu.dot_dimension_numbers<[1], [0], [0], [1], [0, 0, 1, 1], [], []>} : vector<8x8xf32>, vector<8x32xf32>, vector<8x32xf32> -> vector<8x32xf32>
    %162 = arith.addf %144, %161 : vector<8x32xf32>
    %163 = vector.extract_strided_slice %0 {offsets = [8, 0], sizes = [8, 32], strides = [1, 1]} : vector<16x32xf32> to vector<8x32xf32>
    %164 = arith.addf %163, %162 : vector<8x32xf32>
    %c8 = arith.constant 8 : index
    %c0_52 = arith.constant 0 : index
    %165 = vector.load %arg4[%c8, %c0_52] : memref<16x32xf32, #tpu.memory_space<vmem>>, vector<8x32xf32>
    tpu.vector_store %arg4[%c8, %c0_52], %164 {strides = array<i32>} : memref<16x32xf32, #tpu.memory_space<vmem>>, vector<8x32xf32>,
    return
  }
  func.func @transform_0(%arg0: i32) -> (i32, i32) {
    %c0_i32 = arith.constant 0 : i32
    %c0_i32_0 = arith.constant 0 : i32
    %c0_i32_1 = arith.constant 0 : i32
    return %c0_i32, %c0_i32_0 : i32, i32
  }
  func.func @transform_1(%arg0: i32) -> (i32, i32) {
    %c0_i32 = arith.constant 0 : i32
    %c0_i32_0 = arith.constant 0 : i32
    %c0_i32_1 = arith.constant 0 : i32
    return %c0_i32, %c0_i32_0 : i32, i32
  }
  func.func @transform_2(%arg0: i32) -> (i32, i32) {
    %c0_i32 = arith.constant 0 : i32
    %c0_i32_0 = arith.constant 0 : i32
    %c0_i32_1 = arith.constant 0 : i32
    return %c0_i32, %c0_i32_0 : i32, i32
  }
  func.func @transform_3(%arg0: i32) -> (i32, i32) {
    %c0_i32 = arith.constant 0 : i32
    %c0_i32_0 = arith.constant 0 : i32
    %c0_i32_1 = arith.constant 0 : i32
    return %c0_i32, %c0_i32_0 : i32, i32
  }
}

</mosaic_0001>

<bundles_post_ra>
// kernel: tpu_custom_call.1
= control target key start
LH: loop header
LB: loop body
LE: loop exit
PB: predicated region body
PF: predicated region fallthrough
CT: control target
= control target key end

     0   :  { %8 = vsyncpa [#allocation3], 0  ;;  %s2721_s0 = inlined_call_operand.hbm [shape: f32[16,32], index: 0, kind: input, shape index: {}]   ;;  %s2722_s1 = inlined_call_operand.hbm [shape: f32[32,96], index: 1, kind: input, shape index: {}]   ;;  %s2723_s2 = inlined_call_operand.hbm [shape: f32[32,32], index: 2, kind: input, shape index: {}]   ;;  %s2724_s3 = inlined_call_operand.hbm [shape: f32[16,32], index: 3, kind: output, shape index: {}]  }
   0x1   :  { %9 = vsyncpa [#allocation6], 0 }
   0x2   :  { %10 = vsyncpa [#allocation4], 0  ;;  %s2454_s12 = smov [#allocation5]   ;;  %s2455_s14 = smov [#allocation2]  }
   0x3   :  { %s28_s13 = sshll.u32 %s2454_s12, 4  ;;  %s16_s15 = sshll.u32 %s2455_s14, 4  ;;  %s29_s13 = int_to_ptr.vmem [resolvable:$true] %s28_s13  ;;  %s17_s15 = int_to_ptr.vmem [resolvable:$true] %s16_s15 }
   0x4   :  { %s2376_s16 = scalar_lea.vmem %s29_s13, 512  ;;  %p2381_p1 = scmp.lt.s32.totalorder %s29_s13, %s29_s13 }
   0x5   :  { %p2377_p0 = scmp.ne.s32.totalorder %s29_s13, %s2376_s16  ;;  %p2382_p2 = scmp.lt.s32.totalorder %s2376_s16, %s2376_s16 }
   0x7   :  { %p2383_p3 = por %p2382_p2, %p2381_p1 }
   0x9   :  { %p2384_p4 = pnand %p2383_p3, %p2377_p0 }
   0xb   :  { %2387 = shalt.err (!%p2384_p4)
}
   0xc   :  { %s2456_s17 = smov 128   ;;  %s2457_s18 = smov 8  }
   0xd   :  { %34 = dma.hbm_to_vmem [thread:$0]  %s2722_s1, 512, %s29_s13, [#allocation6], %s2456_s17, %s2456_s17, %s2457_s18  }
   0xe   :  { %s2396_s21 = scalar_lea.vmem %s17_s15, 256  ;;  %p2401_p6 = scmp.lt.s32.totalorder %s17_s15, %s17_s15 }
   0xf   :  { %p2397_p5 = scmp.ne.s32.totalorder %s17_s15, %s2396_s21  ;;  %p2402_p7 = scmp.lt.s32.totalorder %s2396_s21, %s2396_s21 }
  0x11   :  { %p2403_p8 = por %p2402_p7, %p2401_p6 }
  0x13   :  { %p2404_p9 = pnand %p2403_p8, %p2397_p5 }
  0x15   :  { %2407 = shalt.err (!%p2404_p9)
}
  0x16   :  { %22 = dma.hbm_to_vmem [thread:$0]  %s2721_s0, 256, %s17_s15, [#allocation3], %s2456_s17, %s2456_s17, %s2457_s18  }
  0x17   :  { %s2458_s24 = smov [#allocation7]  }
  0x18   :  { %s40_s25 = sshll.u32 %s2458_s24, 4  ;;  %s41_s25 = int_to_ptr.vmem [resolvable:$true] %s40_s25 }
  0x19   :  { %s2416_s26 = scalar_lea.vmem %s41_s25, 512  ;;  %p2421_p11 = scmp.lt.s32.totalorder %s41_s25, %s41_s25 }
  0x1a   :  { %p2417_p10 = scmp.ne.s32.totalorder %s41_s25, %s2416_s26  ;;  %p2422_p12 = scmp.lt.s32.totalorder %s2416_s26, %s2416_s26 }
  0x1c   :  { %p2423_p13 = por %p2422_p12, %p2421_p11 }
  0x1e   :  { %p2424_p0 = pnand %p2423_p13, %p2417_p10 }
  0x20   :  { %2427 = shalt.err (!%p2424_p0)
}
  0x21   :  { %46 = dma.hbm_to_vmem [thread:$0]  %s2723_s2, 512, %s41_s25, [#allocation6], %s2456_s17, %s2456_s17, %s2457_s18  }
  0x22   :  { %2448 = dma.done.wait [#allocation3], 256  }
  0x23   :  { %2449 = vsyncadd [#allocation3], 4294967040 }
  0x24   :  { %2450 = dma.done.wait [#allocation6], 1024  }
  0x25   :  { %2451 = vsyncadd [#allocation6], 4294966272  ;;  %v2511_v0 = vld [vmem:[#allocation2] sm:$0xff]  ;;  %vm60_vm0 = vcmask 261120   ;;  %v2513_v1 = vld [vmem:[#allocation2 + $0x8] sm:$0xff]  ;;  %v2459_v20 = vmov 0.0  }
  0x26   :  { %v58_v2 = vmul.f32 %v2511_v0, %v2511_v0  ;;  %v59_v3 = vmul.f32 %v2513_v1, %v2513_v1  ;;  %v79_v6 = vld [vmem:[#allocation5 + $0x18] sm:$0xff]  ;;  %v78_v7 = vld [vmem:[#allocation5 + $0x10] sm:$0xff]  ;;  %v77_v8 = vld [vmem:[#allocation5 + $0x8] sm:$0xff]  ;;  %2193 = vmatprep.subr.mxu1 %v2459_v20  ;;  %vm2460_vm1 = vmmov 0   ;;  %s2461_s0 = smov 120   ;;  %s2462_s2 = smov 96  }
  0x27   :  { %2182 = vmatprep.subr.mxu0 %v79_v6  ;;  %v76_v9 = vld [vmem:[#allocation5] sm:$0xff]  ;;  %2195 = vmatprep.mubr.msk.f32.mxu1 %vm2460_vm1, %v2459_v20  ;;  %s2463_s28 = smov 88   ;;  %vm168_vm2 = vcmask 64512   ;;  %s2464_s29 = smov 56   ;;  %v2575_v51 = vld [vmem:[#allocation7 + $0x8] sm:$0xff] }
  0x28   :  { %v61_v4 = vsel %vm60_vm0, %v58_v2, 0.0  ;;  %v64_v5 = vsel %vm60_vm0, %v59_v3, 0.0  ;;  %2183 = vmatpush3.msra.mxu0 %v79_v6  ;;  %s2465_s30 = smov 64   ;;  %s2466_s4 = smov 80   ;;  %v2572_v50 = vld [vmem:[#allocation7] sm:$0xff] }
  0x29   :  { %62 = vadd.xlane.f32.xlu0 %v61_v4  ;;  %2184 = vmatprep.subr.mxu0 %v78_v7  ;;  %s2467_s5 = smov 112   ;;  %s2468_s6 = smov 48  }
  0x2a   :  { %2185 = vmatpush3.msra.mxu0 %v78_v7  ;;  %s2469_s7 = smov 104   ;;  %s2470_s8 = smov 72  }
  0x2b   :  { %2186 = vmatprep.subr.mxu0 %v77_v8  ;;  %s2471_s9 = smov 40   ;;  %s2472_s10 = smov [#allocation8]  }
  0x2c   :  { %2187 = vmatpush3.msra.mxu0 %v77_v8  ;;  %s2081_s11 = sshll.u32 %s2472_s10, 4  ;;  %s2082_s11 = int_to_ptr.vmem [resolvable:$true] %s2081_s11 }
  0x2d   :  { %65 = vadd.xlane.f32.xlu0 %v64_v5  ;;  %2188 = vmatprep.subr.mxu0 %v76_v9  ;;  %s2428_s12 = scalar_lea.vmem %s2082_s11, 256  ;;  %p2433_p2 = scmp.lt.s32.totalorder %s2082_s11, %s2082_s11 }
  0x2e   :  { %2189 = vmatpush3.msra.mxu0 %v76_v9  ;;  %p2429_p1 = scmp.ne.s32.totalorder %s2082_s11, %s2428_s12  ;;  %p2434_p3 = scmp.lt.s32.totalorder %s2428_s12, %s2428_s12 }
  0x2f   :  { %2203 = vmatprep.subr.mxu0 %v2459_v20 }
  0x30   :  { %p2435_p4 = por %p2434_p3, %p2433_p2 }
  0x32   :  { %p2436_p5 = pnand %p2435_p4, %p2429_p1 }
  0xb2   :  { %v63_v10 = vpop.xlane.xlu0 %62 }
  0xb3   :  { %v68_v11 = vmul.f32 0.03125, %v63_v10 }
  0xb5   :  { %v70_v12 = vadd.f32 1e-06, %v68_v11 }
  0xb6   :  { %v66_v13 = vpop.xlane.xlu0 %65 }
  0xb7   :  { %2332 = vrsqrt.f32 %v70_v12  ;;  %v69_v14 = vmul.f32 0.03125, %v66_v13 }
  0xb9   :  { %v71_v15 = vadd.f32 1e-06, %v69_v14 }
  0xbb   :  { %2334 = vrsqrt.f32 %v71_v15  ;;  %v2608_v15 = vld [vmem:[#allocation7 + $0x10] sm:$0xff] }
  0xc4   :  { %v2333_v16 = vpop.eup %2332 }
  0xc5   :  { %v74_v17 = vmul.f32 %v2333_v16, %v2511_v0 }
  0xc7   :  { %2190 = vmatprep.mubr.msk.f32.mxu0 %vm60_vm0, %v74_v17 }
  0xc8   :  { %v2335_v18 = vpop.eup %2334 }
  0xc9   :  { %v75_v19 = vmul.f32 %v2335_v18, %v2513_v1 }
  0xcb   :  { %2191 = vmatmul.mubr.msk.f32.vlgmr.msra.gmra.mxu0 %vm60_vm0, %v75_v19 }
  0xcc   :  { %2205 = vmatprep.mubr.msk.f32.mxu0 %vm2460_vm1, %v2459_v20 }
 0x18b   :  { %v2531_v21 = vpop.f32.mrf.mxu0 }
 0x18d   :  { %v2533_v22 = vpop.f32.mrf.mxu0 }
 0x18e   :  { %330 = vrot.lane.b32.xlu0 %v2533_v22, %s2461_s0  ;;  %166 = vrot.lane.b32.xlu1 %v2533_v22, %s2462_s2 }
 0x192   :  { %332 = vrot.lane.b32.xlu1 %v2533_v22, %s2463_s28 }
 0x200   :  { %v167_v23 = vpop.permute.xlu1 %166  ;;  %v331_v25 = vpop.permute.xlu0 %330 }
 0x201   :  { %2194 = vmatpush3.xpose.msk.msra.mxu1 %vm168_vm2, %v167_v23 }
 0x202   :  { %2198 = vmatprep.subr.mxu1 %v2459_v20 }
 0x204   :  { %2196 = vmatmul.mubr.msk.f32.vlgmr.msra.gmra.mxu1 %vm168_vm2, %v2533_v22  ;;  %v333_v24 = vpop.permute.xlu1 %332 }
 0x205   :  { %2204 = vmatpush3.xpose.msk.msra.mxu0 %vm168_vm2, %v333_v24  ;;  %2200 = vmatprep.mubr.msk.f32.mxu1 %vm2460_vm1, %v2459_v20 }
 0x206   :  { %2213 = vmatprep.subr.mxu0 %v2459_v20 }
 0x208   :  { %2206 = vmatmul.mubr.msk.f32.vlgmr.msra.gmra.mxu0 %vm168_vm2, %v331_v25 }
 0x209   :  { %2215 = vmatprep.mubr.msk.f32.mxu0 %vm2460_vm1, %v2459_v20  ;;  %2214 = vmatpush3.msra.mxu0 %v2575_v51 }
 0x20a   :  { %2223 = vmatprep.subr.mxu0 %v2459_v20 }
 0x2c4   :  { %v239_v26 = vpop.f32.mrf.mxu1 }
 0x2c5   :  { %v243_v27 = vsel %vm168_vm2, %v239_v26, -inf }
 0x2c6   :  { %244 = vmax.xlane.f32.xlu1 %v243_v27  ;;  %v2197_v28 = vpop.f32.mrf.mxu1 }
 0x2c8   :  { %v404_v29 = vpop.f32.mrf.mxu0 }
 0x2c9   :  { %v408_v30 = vsel %vm168_vm2, %v404_v29, -inf }
 0x2ca   :  { %409 = vmax.xlane.f32.xlu0 %v408_v30  ;;  %v2207_v31 = vpop.f32.mrf.mxu0 }
 0x2e0   :  { %419 = vrot.lane.b32.xlu0 %v2533_v22, %s2464_s29 }
 0x34f   :  { %v245_v32 = vpop.xlane.xlu1 %244 }
 0x350   :  { %v246_v33 = vsub.f32 %v239_v26, %v245_v32 }
 0x352   :  { %v247_v34 = vmul.f32 1.442695, %v246_v33 }
 0x353   :  { %v410_v35 = vpop.xlane.xlu0 %409 }
 0x354   :  { %2336 = vpow2.f32 %v247_v34  ;;  %v411_v36 = vsub.f32 %v404_v29, %v410_v35 }
 0x356   :  { %v412_v37 = vmul.f32 1.442695, %v411_v36 }
 0x357   :  { %v420_v47 = vpop.permute.xlu0 %419 }
 0x358   :  { %2338 = vpow2.f32 %v412_v37 }
 0x361   :  { %v2337_v38 = vpop.eup %2336 }
 0x362   :  { %v249_v39 = vsel %vm168_vm2, %v2337_v38, 0.0 }
 0x363   :  { %250 = vadd.xlane.f32.xlu1 %v249_v39 }
 0x365   :  { %v2339_v40 = vpop.eup %2338 }
 0x366   :  { %v414_v41 = vsel %vm168_vm2, %v2339_v40, 0.0 }
 0x367   :  { %415 = vadd.xlane.f32.xlu1 %v414_v41 }
 0x378   :  { %254 = vrot.lane.b32.xlu1 %v2533_v22, %s2465_s30 }
 0x37c   :  { %643 = vrot.lane.b32.xlu1 %v2533_v22, %s2466_s4 }
 0x380   :  { %641 = vrot.lane.b32.xlu1 %v2533_v22, %s2467_s5 }
 0x3ec   :  { %v251_v42 = vpop.xlane.xlu1 %250 }
 0x3ed   :  { %2340 = vrcp.f32 %v251_v42 }
 0x3f0   :  { %v416_v43 = vpop.xlane.xlu1 %415 }
 0x3f1   :  { %2342 = vrcp.f32 %v416_v43 }
 0x3f4   :  { %v255_v44 = vpop.permute.xlu1 %254 }
 0x3f5   :  { %2199 = vmatpush3.msra.mxu1 %v255_v44 }
 0x3f6   :  { %2208 = vmatprep.subr.mxu1 %v2459_v20 }
 0x3f8   :  { %v644_v53 = vpop.permute.xlu1 %643 }
 0x3fa   :  { %v2341_v45 = vpop.eup %2340 }
 0x3fb   :  { %v253_v46 = vmul.f32 %v2341_v45, %v2337_v38  ;;  %v2642_v38 = vld [vmem:[#allocation7 + $0x18] sm:$0xff] }
 0x3fc   :  { %v642_v57 = vpop.permute.xlu1 %641 }
 0x3fd   :  { %2201 = vmatmul.mubr.msk.f32.vlgmr.msra.gmra.mxu1 %vm168_vm2, %v253_v46 }
 0x3fe   :  { %v2343_v48 = vpop.eup %2342  ;;  %2209 = vmatpush3.msra.mxu1 %v420_v47  ;;  %2210 = vmatprep.mubr.msk.f32.mxu1 %vm2460_vm1, %v2459_v20 }
 0x3ff   :  { %v418_v49 = vmul.f32 %v2343_v48, %v2339_v40  ;;  %2218 = vmatprep.subr.mxu1 %v2459_v20 }
 0x401   :  { %2211 = vmatmul.mubr.msk.f32.vlgmr.msra.gmra.mxu1 %vm168_vm2, %v418_v49 }
 0x402   :  { %2220 = vmatprep.mubr.msk.f32.mxu1 %vm2460_vm1, %v2459_v20  ;;  %2219 = vmatpush3.msra.mxu1 %v2572_v50 }
 0x403   :  { %2228 = vmatprep.subr.mxu1 %v2459_v20 }
 0x4bd   :  { %v326_v52 = vpop.f32.mrf.mxu1 }
 0x4be   :  { %2221 = vmatmul.mubr.msk.f32.vlgmr.msra.gmra.mxu1 %vm168_vm2, %v326_v52 }
 0x4bf   :  { %v2202_v54 = vpop.f32.mrf.mxu1  ;;  %2230 = vmatprep.mubr.msk.f32.mxu1 %vm2460_vm1, %v2459_v20 }
 0x4c1   :  { %v491_v55 = vpop.f32.mrf.mxu1 }
 0x4c2   :  { %2216 = vmatmul.mubr.msk.f32.vlgmr.msra.gmra.mxu0 %vm168_vm2, %v491_v55 }
 0x4c3   :  { %2224 = vmatpush3.xpose.msk.msra.mxu0 %vm168_vm2, %v644_v53  ;;  %v2212_v56 = vpop.f32.mrf.mxu1  ;;  %2225 = vmatprep.mubr.msk.f32.mxu0 %vm2460_vm1, %v2459_v20 }
 0x4c4   :  { %2233 = vmatprep.subr.mxu0 %v2459_v20 }
 0x4c6   :  { %2226 = vmatmul.mubr.msk.f32.vlgmr.msra.gmra.mxu0 %vm168_vm2, %v642_v57 }
 0x4c7   :  { %2235 = vmatprep.mubr.msk.f32.mxu0 %vm2460_vm1, %v2459_v20  ;;  %2234 = vmatpush3.msra.mxu0 %v2608_v15 }
 0x4c8   :  { %2243 = vmatprep.subr.mxu0 %v2459_v20 }
 0x57e   :  { %v637_v58 = vpop.f32.mrf.mxu1 }
 0x580   :  { %v2222_v59 = vpop.f32.mrf.mxu1 }
 0x582   :  { %v564_v60 = vpop.f32.mrf.mxu0 }
 0x583   :  { %v638_v61 = vadd.f32 %v637_v58, %v564_v60 }
 0x584   :  { %v2217_v62 = vpop.f32.mrf.mxu0 }
 0x586   :  { %v715_v63 = vpop.f32.mrf.mxu0 }
 0x587   :  { %v719_v2 = vsel %vm168_vm2, %v715_v63, -inf }
 0x588   :  { %720 = vmax.xlane.f32.xlu1 %v719_v2  ;;  %v2227_v3 = vpop.f32.mrf.mxu0 }
 0x599   :  { %730 = vrot.lane.b32.xlu1 %v2533_v22, %s2468_s6 }
 0x59d   :  { %880 = vrot.lane.b32.xlu1 %v2533_v22, %s2469_s7 }
 0x611   :  { %v721_v4 = vpop.xlane.xlu1 %720 }
 0x612   :  { %v722_v5 = vsub.f32 %v715_v63, %v721_v4 }
 0x614   :  { %v723_v6 = vmul.f32 1.442695, %v722_v5 }
 0x615   :  { %v731_v7 = vpop.permute.xlu1 %730 }
 0x616   :  { %2344 = vpow2.f32 %v723_v6  ;;  %2229 = vmatpush3.msra.mxu1 %v731_v7 }
 0x617   :  { %2238 = vmatprep.subr.mxu1 %v2459_v20 }
 0x619   :  { %v881_v14 = vpop.permute.xlu1 %880 }
 0x623   :  { %v2345_v8 = vpop.eup %2344 }
 0x624   :  { %v725_v9 = vsel %vm168_vm2, %v2345_v8, 0.0 }
 0x625   :  { %726 = vadd.xlane.f32.xlu0 %v725_v9 }
 0x63b   :  { %882 = vrot.lane.b32.xlu0 %v2533_v22, %s2470_s8 }
 0x6ae   :  { %v727_v10 = vpop.xlane.xlu0 %726 }
 0x6af   :  { %2346 = vrcp.f32 %v727_v10 }
 0x6b2   :  { %v883_v13 = vpop.permute.xlu0 %882 }
 0x6bc   :  { %v2347_v11 = vpop.eup %2346 }
 0x6bd   :  { %v729_v12 = vmul.f32 %v2347_v11, %v2345_v8 }
 0x6bf   :  { %2231 = vmatmul.mubr.msk.f32.vlgmr.msra.gmra.mxu1 %vm168_vm2, %v729_v12 }
 0x6c0   :  { %2239 = vmatpush3.xpose.msk.msra.mxu1 %vm168_vm2, %v883_v13  ;;  %2240 = vmatprep.mubr.msk.f32.mxu1 %vm2460_vm1, %v2459_v20 }
 0x6c1   :  { %2248 = vmatprep.subr.mxu1 %v2459_v20 }
 0x6c3   :  { %2241 = vmatmul.mubr.msk.f32.vlgmr.msra.gmra.mxu1 %vm168_vm2, %v881_v14 }
 0x6c4   :  { %2250 = vmatprep.mubr.msk.f32.mxu1 %vm2460_vm1, %v2459_v20  ;;  %2249 = vmatpush3.msra.mxu1 %v2642_v38 }
 0x6c5   :  { %2258 = vmatprep.subr.mxu1 %v2459_v20 }
 0x77f   :  { %v802_v16 = vpop.f32.mrf.mxu1 }
 0x780   :  { %2236 = vmatmul.mubr.msk.f32.vlgmr.msra.gmra.mxu0 %vm168_vm2, %v802_v16 }
 0x781   :  { %v2232_v17 = vpop.f32.mrf.mxu1  ;;  %2245 = vmatprep.mubr.msk.f32.mxu0 %vm2460_vm1, %v2459_v20 }
 0x783   :  { %v954_v18 = vpop.f32.mrf.mxu1 }
 0x784   :  { %v958_v19 = vsel %vm168_vm2, %v954_v18, -inf }
 0x785   :  { %959 = vmax.xlane.f32.xlu1 %v958_v19  ;;  %v2242_v23 = vpop.f32.mrf.mxu1 }
 0x796   :  { %1122 = vrot.lane.b32.xlu1 %v2531_v21, %s2462_s2 }
 0x79a   :  { %1287 = vrot.lane.b32.xlu1 %v2531_v21, %s2463_s28 }
 0x80e   :  { %v960_v24 = vpop.xlane.xlu1 %959 }
 0x80f   :  { %v961_v25 = vsub.f32 %v954_v18, %v960_v24 }
 0x811   :  { %v962_v26 = vmul.f32 1.442695, %v961_v25 }
 0x812   :  { %v1123_v35 = vpop.permute.xlu1 %1122 }
 0x813   :  { %2348 = vpow2.f32 %v962_v26 }
 0x820   :  { %v2349_v27 = vpop.eup %2348 }
 0x821   :  { %v964_v28 = vsel %vm168_vm2, %v2349_v27, 0.0 }
 0x822   :  { %965 = vadd.xlane.f32.xlu0 %v964_v28 }
 0x838   :  { %969 = vrot.lane.b32.xlu0 %v2533_v22, %s2471_s9  ;;  %v1288_v22 = vpop.permute.xlu1 %1287 }
 0x83c   :  { %1285 = vrot.lane.b32.xlu0 %v2531_v21, %s2461_s0 }
 0x840   :  { %v875_v29 = vpop.f32.mrf.mxu0 }
 0x841   :  { %v879_v30 = vadd.f32 %v875_v29, %v638_v61 }
 0x842   :  { %v2237_v31 = vpop.f32.mrf.mxu0 }
 0x8ab   :  { %v966_v32 = vpop.xlane.xlu0 %965 }
 0x8ac   :  { %2350 = vrcp.f32 %v966_v32 }
 0x8af   :  { %v970_v33 = vpop.permute.xlu0 %969 }
 0x8b0   :  { %2244 = vmatpush3.msra.mxu0 %v970_v33 }
 0x8b1   :  { %2253 = vmatprep.subr.mxu0 %v2459_v20 }
 0x8b3   :  { %v1286_v37 = vpop.permute.xlu0 %1285 }
 0x8b9   :  { %v2351_v34 = vpop.eup %2350 }
 0x8ba   :  { %v968_v36 = vmul.f32 %v2351_v34, %v2349_v27 }
 0x8bc   :  { %2246 = vmatmul.mubr.msk.f32.vlgmr.msra.gmra.mxu0 %vm168_vm2, %v968_v36 }
 0x8bd   :  { %2254 = vmatpush3.xpose.msk.msra.mxu0 %vm168_vm2, %v1123_v35  ;;  %2255 = vmatprep.mubr.msk.f32.mxu0 %vm2460_vm1, %v2459_v20 }
 0x8be   :  { %2263 = vmatprep.subr.mxu0 %v2459_v20 }
 0x8c0   :  { %2256 = vmatmul.mubr.msk.f32.vlgmr.msra.gmra.mxu0 %vm168_vm2, %v2531_v21 }
 0x8c1   :  { %2264 = vmatpush3.xpose.msk.msra.mxu0 %vm168_vm2, %v1288_v22  ;;  %2265 = vmatprep.mubr.msk.f32.mxu0 %vm2460_vm1, %v2459_v20 }
 0x8c2   :  { %2273 = vmatprep.subr.mxu0 %v2459_v20 }
 0x8c4   :  { %2266 = vmatmul.mubr.msk.f32.vlgmr.msra.gmra.mxu0 %vm168_vm2, %v1286_v37 }
 0x8c5   :  { %2274 = vmatpush3.msra.mxu0 %v2575_v51  ;;  %2275 = vmatprep.mubr.msk.f32.mxu0 %vm2460_vm1, %v2459_v20 }
 0x8c6   :  { %2283 = vmatprep.subr.mxu0 %v2459_v20 }
 0x97c   :  { %v1041_v39 = vpop.f32.mrf.mxu0 }
 0x97d   :  { %2251 = vmatmul.mubr.msk.f32.vlgmr.msra.gmra.mxu1 %vm168_vm2, %v1041_v39 }
 0x97e   :  { %v2247_v40 = vpop.f32.mrf.mxu0  ;;  %2260 = vmatprep.mubr.msk.f32.mxu1 %vm2460_vm1, %v2459_v20 }
 0x980   :  { %v1194_v41 = vpop.f32.mrf.mxu0 }
 0x981   :  { %v1198_v42 = vsel %vm168_vm2, %v1194_v41, -inf }
 0x982   :  { %1199 = vmax.xlane.f32.xlu1 %v1198_v42  ;;  %v2257_v43 = vpop.f32.mrf.mxu0 }
 0x984   :  { %v1359_v44 = vpop.f32.mrf.mxu0 }
 0x985   :  { %v1363_v45 = vsel %vm168_vm2, %v1359_v44, -inf }
 0x986   :  { %1364 = vmax.xlane.f32.xlu0 %v1363_v45  ;;  %v2267_v46 = vpop.f32.mrf.mxu0 }
 0xa0b   :  { %v1200_v47 = vpop.xlane.xlu1 %1199 }
 0xa0c   :  { %v1201_v48 = vsub.f32 %v1194_v41, %v1200_v47 }
 0xa0e   :  { %v1202_v49 = vmul.f32 1.442695, %v1201_v48 }
 0xa0f   :  { %v1365_v51 = vpop.xlane.xlu0 %1364 }
 0xa10   :  { %2352 = vpow2.f32 %v1202_v49  ;;  %v1366_v52 = vsub.f32 %v1359_v44, %v1365_v51 }
 0xa12   :  { %v1367_v53 = vmul.f32 1.442695, %v1366_v52 }
 0xa14   :  { %2354 = vpow2.f32 %v1367_v53 }
 0xa1d   :  { %v2353_v54 = vpop.eup %2352 }
 0xa1e   :  { %v1204_v55 = vsel %vm168_vm2, %v2353_v54, 0.0 }
 0xa1f   :  { %1205 = vadd.xlane.f32.xlu0 %v1204_v55 }
 0xa21   :  { %v2355_v56 = vpop.eup %2354 }
 0xa22   :  { %v1369_v57 = vsel %vm168_vm2, %v2355_v56, 0.0 }
 0xa23   :  { %1370 = vadd.xlane.f32.xlu1 %v1369_v57 }
 0xa34   :  { %1374 = vrot.lane.b32.xlu1 %v2531_v21, %s2464_s29 }
 0xa35   :  { %1209 = vrot.lane.b32.xlu0 %v2531_v21, %s2465_s30 }
 0xa38   :  { %1598 = vrot.lane.b32.xlu1 %v2531_v21, %s2466_s4 }
 0xa39   :  { %1596 = vrot.lane.b32.xlu0 %v2531_v21, %s2467_s5 }
 0xa3d   :  { %v1114_v58 = vpop.f32.mrf.mxu1 }
 0xa3e   :  { %v1118_v59 = vadd.f32 %v1114_v58, %v879_v30 }
 0xa3f   :  { %v2252_v60 = vpop.f32.mrf.mxu1 }
 0xa40   :  { %v1119_v61 = vadd.f32 %v1118_v59, %v2511_v0 }
 0xa42   :  { %1120 = vst.msk [vmem:[#allocation8] sm:$0xff] %vm60_vm0, %v1119_v61 }
 0xaa8   :  { %v1206_v62 = vpop.xlane.xlu0 %1205 }
 0xaa9   :  { %2356 = vrcp.f32 %v1206_v62 }
 0xaac   :  { %v1371_v63 = vpop.xlane.xlu1 %1370  ;;  %v1210_v2 = vpop.permute.xlu0 %1209 }
 0xaad   :  { %2358 = vrcp.f32 %v1371_v63  ;;  %2259 = vmatpush3.msra.mxu1 %v1210_v2 }
 0xaae   :  { %2268 = vmatprep.subr.mxu1 %v2459_v20 }
 0xab0   :  { %v1375_v5 = vpop.permute.xlu1 %1374 }
 0xab4   :  { %v1599_v10 = vpop.permute.xlu1 %1598 }
 0xab6   :  { %v2357_v3 = vpop.eup %2356 }
 0xab7   :  { %v1208_v4 = vmul.f32 %v2357_v3, %v2353_v54 }
 0xab9   :  { %2261 = vmatmul.mubr.msk.f32.vlgmr.msra.gmra.mxu1 %vm168_vm2, %v1208_v4 }
 0xaba   :  { %v2359_v6 = vpop.eup %2358  ;;  %2269 = vmatpush3.msra.mxu1 %v1375_v5  ;;  %2270 = vmatprep.mubr.msk.f32.mxu1 %vm2460_vm1, %v2459_v20 }
 0xabb   :  { %v1373_v0 = vmul.f32 %v2359_v6, %v2355_v56  ;;  %2278 = vmatprep.subr.mxu1 %v2459_v20 }
 0xabd   :  { %2271 = vmatmul.mubr.msk.f32.vlgmr.msra.gmra.mxu1 %vm168_vm2, %v1373_v0 }
 0xabe   :  { %2279 = vmatpush3.msra.mxu1 %v2572_v50  ;;  %2280 = vmatprep.mubr.msk.f32.mxu1 %vm2460_vm1, %v2459_v20  ;;  %v1597_v50 = vpop.permute.xlu0 %1596 }
 0xabf   :  { %2288 = vmatprep.subr.mxu1 %v2459_v20 }
 0xb79   :  { %v1281_v7 = vpop.f32.mrf.mxu1 }
 0xb7a   :  { %2281 = vmatmul.mubr.msk.f32.vlgmr.msra.gmra.mxu1 %vm168_vm2, %v1281_v7 }
 0xb7b   :  { %v2262_v8 = vpop.f32.mrf.mxu1  ;;  %2290 = vmatprep.mubr.msk.f32.mxu1 %vm2460_vm1, %v2459_v20 }
 0xb7d   :  { %v1446_v9 = vpop.f32.mrf.mxu1 }
 0xb7e   :  { %2276 = vmatmul.mubr.msk.f32.vlgmr.msra.gmra.mxu0 %vm168_vm2, %v1446_v9 }
 0xb7f   :  { %2284 = vmatpush3.xpose.msk.msra.mxu0 %vm168_vm2, %v1599_v10  ;;  %v2272_v11 = vpop.f32.mrf.mxu1  ;;  %2285 = vmatprep.mubr.msk.f32.mxu0 %vm2460_vm1, %v2459_v20 }
 0xb80   :  { %2293 = vmatprep.subr.mxu0 %v2459_v20 }
 0xb82   :  { %2286 = vmatmul.mubr.msk.f32.vlgmr.msra.gmra.mxu0 %vm168_vm2, %v1597_v50 }
 0xb83   :  { %2294 = vmatpush3.msra.mxu0 %v2608_v15  ;;  %2295 = vmatprep.mubr.msk.f32.mxu0 %vm2460_vm1, %v2459_v20 }
 0xb84   :  { %2303 = vmatprep.subr.mxu0 %v2459_v20 }
 0xc3a   :  { %v1592_v12 = vpop.f32.mrf.mxu1 }
 0xc3c   :  { %v2282_v13 = vpop.f32.mrf.mxu1 }
 0xc3e   :  { %v1519_v14 = vpop.f32.mrf.mxu0 }
 0xc3f   :  { %v1593_v16 = vadd.f32 %v1592_v12, %v1519_v14 }
 0xc40   :  { %v2277_v17 = vpop.f32.mrf.mxu0 }
 0xc42   :  { %v1670_v18 = vpop.f32.mrf.mxu0 }
 0xc43   :  { %v1674_v19 = vsel %vm168_vm2, %v1670_v18, -inf }
 0xc44   :  { %1675 = vmax.xlane.f32.xlu1 %v1674_v19  ;;  %v2287_v23 = vpop.f32.mrf.mxu0 }
 0xc55   :  { %1837 = vrot.lane.b32.xlu1 %v2531_v21, %s2470_s8 }
 0xc59   :  { %1835 = vrot.lane.b32.xlu1 %v2531_v21, %s2469_s7 }
 0xccd   :  { %v1676_v15 = vpop.xlane.xlu1 %1675 }
 0xcce   :  { %v1677_v24 = vsub.f32 %v1670_v18, %v1676_v15 }
 0xcd0   :  { %v1678_v25 = vmul.f32 1.442695, %v1677_v24 }
 0xcd1   :  { %v1838_v31 = vpop.permute.xlu1 %1837 }
 0xcd2   :  { %2360 = vpow2.f32 %v1678_v25 }
 0xcd5   :  { %v1836_v33 = vpop.permute.xlu1 %1835 }
 0xcdf   :  { %v2361_v26 = vpop.eup %2360 }
 0xce0   :  { %v1680_v27 = vsel %vm168_vm2, %v2361_v26, 0.0 }
 0xce1   :  { %1681 = vadd.xlane.f32.xlu0 %v1680_v27 }
 0xcf7   :  { %1685 = vrot.lane.b32.xlu0 %v2531_v21, %s2468_s6 }
 0xd6a   :  { %v1682_v28 = vpop.xlane.xlu0 %1681 }
 0xd6b   :  { %2362 = vrcp.f32 %v1682_v28 }
 0xd6e   :  { %v1686_v29 = vpop.permute.xlu0 %1685 }
 0xd6f   :  { %2289 = vmatpush3.msra.mxu1 %v1686_v29 }
 0xd70   :  { %2298 = vmatprep.subr.mxu1 %v2459_v20 }
 0xd78   :  { %v2363_v30 = vpop.eup %2362 }
 0xd79   :  { %v1684_v32 = vmul.f32 %v2363_v30, %v2361_v26 }
 0xd7b   :  { %2291 = vmatmul.mubr.msk.f32.vlgmr.msra.gmra.mxu1 %vm168_vm2, %v1684_v32 }
 0xd7c   :  { %2299 = vmatpush3.xpose.msk.msra.mxu1 %vm168_vm2, %v1838_v31  ;;  %2300 = vmatprep.mubr.msk.f32.mxu1 %vm2460_vm1, %v2459_v20 }
 0xd7d   :  { %2308 = vmatprep.subr.mxu1 %v2459_v20 }
 0xd7f   :  { %2301 = vmatmul.mubr.msk.f32.vlgmr.msra.gmra.mxu1 %vm168_vm2, %v1836_v33 }
 0xd80   :  { %2309 = vmatpush3.msra.mxu1 %v2642_v38  ;;  %2310 = vmatprep.mubr.msk.f32.mxu1 %vm2460_vm1, %v2459_v20 }
 0xe3b   :  { %v1757_v34 = vpop.f32.mrf.mxu1 }
 0xe3c   :  { %2296 = vmatmul.mubr.msk.f32.vlgmr.msra.gmra.mxu0 %vm168_vm2, %v1757_v34 }
 0xe3d   :  { %v2292_v35 = vpop.f32.mrf.mxu1  ;;  %2305 = vmatprep.mubr.msk.f32.mxu0 %vm2460_vm1, %v2459_v20 }
 0xe3f   :  { %v1909_v36 = vpop.f32.mrf.mxu1 }
 0xe40   :  { %v1913_v22 = vsel %vm168_vm2, %v1909_v36, -inf }
 0xe41   :  { %1914 = vmax.xlane.f32.xlu0 %v1913_v22  ;;  %v2302_v37 = vpop.f32.mrf.mxu1 }
 0xe57   :  { %1924 = vrot.lane.b32.xlu0 %v2531_v21, %s2471_s9 }
 0xeca   :  { %v1915_v39 = vpop.xlane.xlu0 %1914 }
 0xecb   :  { %v1916_v38 = vsub.f32 %v1909_v36, %v1915_v39 }
 0xecd   :  { %v1917_v40 = vmul.f32 1.442695, %v1916_v38 }
 0xece   :  { %v1925_v41 = vpop.permute.xlu0 %1924 }
 0xecf   :  { %2364 = vpow2.f32 %v1917_v40  ;;  %2304 = vmatpush3.msra.mxu0 %v1925_v41 }
 0xedc   :  { %v2365_v42 = vpop.eup %2364 }
 0xedd   :  { %v1919_v43 = vsel %vm168_vm2, %v2365_v42, 0.0 }
 0xede   :  { %1920 = vadd.xlane.f32.xlu1 %v1919_v43 }
 0xefc   :  { %v1830_v44 = vpop.f32.mrf.mxu0 }
 0xefd   :  { %v1834_v20 = vadd.f32 %v1830_v44, %v1593_v16 }
 0xefe   :  { %v2297_v45 = vpop.f32.mrf.mxu0 }
 0xf67   :  { %v1921_v46 = vpop.xlane.xlu1 %1920 }
 0xf68   :  { %2366 = vrcp.f32 %v1921_v46 }
 0xf75   :  { %v2367_v47 = vpop.eup %2366 }
 0xf76   :  { %v1923_v48 = vmul.f32 %v2367_v47, %v2365_v42 }
 0xf78   :  { %2306 = vmatmul.mubr.msk.f32.vlgmr.msra.gmra.mxu0 %vm168_vm2, %v1923_v48 }
0x1038   :  { %v1996_v21 = vpop.f32.mrf.mxu0 }
0x1039   :  { %2311 = vmatmul.mubr.msk.f32.vlgmr.msra.gmra.mxu1 %vm168_vm2, %v1996_v21 }
0x103a   :  { %v2307_v49 = vpop.f32.mrf.mxu0 }
0x10f9   :  { %v2069_v51 = vpop.f32.mrf.mxu1 }
0x10fa   :  { %v2073_v52 = vadd.f32 %v2069_v51, %v1834_v20 }
0x10fb   :  { %v2312_v53 = vpop.f32.mrf.mxu1 }
0x10fc   :  { %v2074_v54 = vadd.f32 %v2073_v52, %v2513_v1 }
0x10fe   :  { %2075 = vst.msk [vmem:[#allocation8 + $0x8] sm:$0xff] %vm60_vm0, %v2074_v54 }
0x10ff   :  { %2439 = shalt.err (!%p2436_p5)
}
0x1100   :  { %2087 = dma.vmem_to_hbm [thread:$0]  %s2082_s11, 256, %s2724_s3, [#allocation4], %s2456_s17, %s2456_s17, %s2457_s18  }
0x1101   :  { %2452 = dma.done.wait [#allocation4], 256  }
0x1102   :  { %2453 = vsyncadd [#allocation4], 4294967040 }
0x1103   :  { %2091 = vsyncpa [#allocation3], 1 }
0x1104   :  { %2092 = vsyncpa [#allocation6], 1 }
0x1105   :  { %2093 = vsyncpa [#allocation4], 1 }

</bundles_post_ra>
